<compile_context>
chip_gen: v6e
topology: v6e:2x2x1
jax: 0.10.0
libtpu: 0.0.40
codegen_flags: <defaults>
</compile_context>

<pallas_src>
from functools import partial

import jax
import jax.numpy as jnp
from jax.experimental import pallas as pl
from jax.experimental.pallas import tpu as pltpu


def _round_up(x, m):
    return (x + m - 1) // m * m


# ----------------------------- Pallas kernels --------------------------------
def _proj_kernel(x_ref, w_ref, b_ref, o_ref):
    # x_ref: (TM, K) bf16 patch tile, w_ref: (K, N) bf16, b_ref: (1, N) f32
    acc = jnp.dot(x_ref[...], w_ref[...], preferred_element_type=jnp.float32)
    o_ref[...] = (acc + b_ref[...]).astype(o_ref.dtype)


def _proj_norm_kernel(x_ref, w_ref, b_ref, g_ref, bt_ref, o_ref, *, eps):
    # Same as above plus a fused LayerNorm over the embedding (last) axis, in f32.
    acc = jnp.dot(x_ref[...], w_ref[...], preferred_element_type=jnp.float32)
    y = acc + b_ref[...]
    mu = jnp.mean(y, axis=-1, keepdims=True)
    d = y - mu
    var = jnp.mean(d * d, axis=-1, keepdims=True)
    yn = d * jax.lax.rsqrt(var + eps)
    o_ref[...] = (yn * g_ref[...] + bt_ref[...]).astype(o_ref.dtype)


def _choose_tm(M, tm_req, *, min_grid=4, tm_floor=1024):
    """Adaptive M tile.

    As large as requested (amortize per-step overhead), but:
      * never (much) larger than M,
      * keep >= min_grid grid steps when that does not shrink the tile below
        tm_floor rows, so the "parallel" grid axis can shard across v7x's 2 TCs,
      * always a multiple of 16 (bf16 sublane packing).
    """
    M = max(int(M), 1)
    tm_req = max(16, _round_up(int(tm_req), 16))
    tm_cap = _round_up(M, 16)                       # no benefit beyond M
    tm_split = _round_up(pl.cdiv(M, min_grid), 16)  # tile giving ~min_grid steps
    return max(16, min(tm_req, tm_cap, max(tm_split, min(tm_floor, tm_cap))))


def _patch_embed_matmul(patches, weight, bias, gamma=None, beta=None, *,
                        out_dtype=jnp.bfloat16, tm=8192, eps=1e-5,
                        input_buffers=2):
    """patches: (M, K), weight: (K, N), bias: (N,) -> (M, N) in out_dtype.

    Ragged last tile is handled by the Pallas pipeline itself (pl.cdiv grid +
    clipped edge-block DMAs): no wrapper-level pad / slice HBM passes.
    """
    M, K = patches.shape
    K2, N = weight.shape
    assert K == K2, (K, K2)

    tm = _choose_tm(M, tm)
    grid = (pl.cdiv(M, tm),)

    bias2 = bias.reshape(1, N).astype(jnp.float32)
    args = [patches, weight, bias2]

    if input_buffers and int(input_buffers) > 2:
        # v7x option: a 3rd buffer hides DMA-start latency of the short per-step copy.
        patch_spec = pl.BlockSpec((tm, K), lambda i: (i, 0),
                                  pipeline_mode=pl.Buffered(int(input_buffers)))
    else:
        patch_spec = pl.BlockSpec((tm, K), lambda i: (i, 0))

    in_specs = [
        patch_spec,                               # streamed patch tiles
        pl.BlockSpec((K, N), lambda i: (0, 0)),   # weight stays VMEM-resident
        pl.BlockSpec((1, N), lambda i: (0, 0)),   # bias stays VMEM-resident
    ]
    if gamma is not None:
        args += [gamma.reshape(1, N).astype(jnp.float32),
                 beta.reshape(1, N).astype(jnp.float32)]
        in_specs += [pl.BlockSpec((1, N), lambda i: (0, 0)),
                     pl.BlockSpec((1, N), lambda i: (0, 0))]
        kernel = partial(_proj_norm_kernel, eps=eps)
    else:
        kernel = _proj_kernel

    out_itemsize = jnp.dtype(out_dtype).itemsize
    bytes_accessed = int(
        M * K * patches.dtype.itemsize
        + K * N * weight.dtype.itemsize
        + (len(args) - 2) * N * 4
        + M * N * out_itemsize)
    cost = pl.CostEstimate(
        flops=2 * M * K * N,
        transcendentals=(M if gamma is not None else 0),
        bytes_accessed=bytes_accessed)

    return pl.pallas_call(
        kernel,
        out_shape=jax.ShapeDtypeStruct((M, N), out_dtype),
        grid_spec=pltpu.PrefetchScalarGridSpec(
            num_scalar_prefetch=0,
            grid=grid,
            in_specs=in_specs,
            # N=96 (<128 lanes) -> masked vst at 75% lane occupancy; left as-is on
            # purpose (padding N would add write traffic to an HBM-bound kernel).
            out_specs=pl.BlockSpec((tm, N), lambda i: (i, 0)),
        ),
        compiler_params=pltpu.CompilerParams(
            # Independent M tiles -> parallel (lets v7x shard across its 2 TCs).
            dimension_semantics=("parallel",),
            # <=32 MiB so two TCs' scratch fits comfortably in v7x's 64 MiB VMEM.
            vmem_limit_bytes=32 * 1024 * 1024,
            # Let XLA fuse the patch-layout transpose into this operand (verify in
            # a profile -- see TODO at top of file).
            allow_input_fusion=[True] + [False] * (len(args) - 1),
        ),
        cost_estimate=cost,
    )(*args)


# ----------------------------- Module wrapper --------------------------------
class PatchEmbed:
    """Image -> Patch Embedding (Conv2d k=s=patch_size), optionally fused LayerNorm.

    Matches the PyTorch PatchEmbed; the Transformer backbone uses it with
    patch_norm=True (use_norm=True here). Output dtype defaults to bfloat16
    (pass out_dtype=jnp.float32 if downstream code requires f32).
    """

    def __init__(self, patch_size=4, in_channels=3, embed_dim=96, use_norm=False,
                 key=None, compute_dtype=jnp.bfloat16, out_dtype=jnp.bfloat16,
                 tm=8192, input_buffers=2, ln_gamma=None, ln_beta=None):
        self.patch_size = (patch_size, patch_size)
        self.in_channels = in_channels
        self.embed_dim = embed_dim
        self.use_norm = use_norm
        self.compute_dtype = compute_dtype
        self.out_dtype = out_dtype
        # Tile: largest is best on all gens (most of all on v7x); _choose_tm clamps
        # adaptively to keep a multi-step "parallel" grid when M allows it.
        self.tm = tm
        self.input_buffers = input_buffers   # set 3 on v7x if profiles show exposed DMA
        self.ln_eps = 1e-5

        if key is None:
            key = jax.random.PRNGKey(0)
        kw, kb = jax.random.split(key)
        ph, pw = self.patch_size
        fan_in = in_channels * ph * pw
        bound = 1.0 / jnp.sqrt(fan_in)
        # Conv2d weight: (embed_dim, in_channels, ph, pw), bias: (embed_dim,)
        self.conv_weight = jax.random.uniform(
            kw, (embed_dim, in_channels, ph, pw), jnp.float32, -bound, bound)
        self.conv_bias = jax.random.uniform(
            kb, (embed_dim,), jnp.float32, -bound, bound)
        # LayerNorm affine (PyTorch init: ones / zeros, unless provided).
        self.ln_gamma = (jnp.asarray(ln_gamma, jnp.float32) if ln_gamma is not None
                         else jnp.ones((embed_dim,), jnp.float32))
        self.ln_beta = (jnp.asarray(ln_beta, jnp.float32) if ln_beta is not None
                        else jnp.zeros((embed_dim,), jnp.float32))

        # --- cached kernel-ready operands (no per-call transpose/cast HLO) ---
        E, C = embed_dim, in_channels
        # NCHW patch order (c, i, j):
        self._w_nchw = self.conv_weight.reshape(E, C * ph * pw).T.astype(compute_dtype)
        # NHWC patch order (i, j, c):
        self._w_nhwc = jnp.transpose(self.conv_weight, (2, 3, 1, 0)) \
                          .reshape(ph * pw * C, E).astype(compute_dtype)
        self._bias_f32 = self.conv_bias.astype(jnp.float32)
        self._gamma_f32 = self.ln_gamma.astype(jnp.float32)
        self._beta_f32 = self.ln_beta.astype(jnp.float32)

    def __call__(self, x, channels_last=True, input_format="NCHW"):
        ph, pw = self.patch_size
        E = self.embed_dim
        if input_format == "NHWC":
            B, H, W, C = x.shape
        else:
            B, C, H, W = x.shape
        assert C == self.in_channels, (C, self.in_channels)

        pad_h = (ph - H % ph) % ph
        pad_w = (pw - W % pw) % pw

        # Cast first so any padding / layout permute moves bf16 bytes.
        xc = x.astype(self.compute_dtype)
        if pad_h or pad_w:
            if input_format == "NHWC":
                xc = jnp.pad(xc, ((0, 0), (0, pad_h), (0, pad_w), (0, 0)))
            else:
                xc = jnp.pad(xc, ((0, 0), (0, 0), (0, pad_h), (0, pad_w)))
        Hp = (H + pad_h) // ph
        Wp = (W + pad_w) // pw

        if input_format == "NHWC":
            # Patch flattened in (ph, pw, C) order; cached weight matches.
            xp = xc.reshape(B, Hp, ph, Wp, pw, C)
            xp = jnp.transpose(xp, (0, 1, 3, 2, 4, 5))
            patches = xp.reshape(B * Hp * Wp, ph * pw * C)
            w = self._w_nhwc
        else:
            # Patch flattened in (C, ph, pw) order, matching Conv2d weight layout.
            xp = xc.reshape(B, C, Hp, ph, Wp, pw)
            xp = jnp.transpose(xp, (0, 2, 4, 1, 3, 5))
            patches = xp.reshape(B * Hp * Wp, C * ph * pw)
            w = self._w_nchw

        out = _patch_embed_matmul(
            patches, w, self._bias_f32,
            gamma=self._gamma_f32 if self.use_norm else None,
            beta=self._beta_f32 if self.use_norm else None,
            out_dtype=self.out_dtype, tm=self.tm, eps=self.ln_eps,
            input_buffers=self.input_buffers)

        out = out.reshape(B, Hp, Wp, E)              # channels-last (lane-dense E)
        if not channels_last:
            out = jnp.transpose(out, (0, 3, 1, 2))   # exact PyTorch NCHW layout
        return out


# ----------------------------- Pure-JAX reference --------------------------------
def _reference_patch_embed(x, weight, bias, patch_size, gamma=None, beta=None,
                           eps=1e-5, compute_dtype=jnp.bfloat16):
    """Strided conv (+ optional LayerNorm) reference, on the same bf16-rounded inputs."""
    ph, pw = patch_size
    xq = x.astype(compute_dtype).astype(jnp.float32)
    wq = weight.astype(compute_dtype).astype(jnp.float32)
    B, C, H, W = xq.shape
    pad_h = (ph - H % ph) % ph
    pad_w = (pw - W % pw) % pw
    if pad_h or pad_w:
        xq = jnp.pad(xq, ((0, 0), (0, 0), (0, pad_h), (0, pad_w)))
    y = jax.lax.conv_general_dilated(
        xq, wq, window_strides=(ph, pw), padding="VALID",
        dimension_numbers=("NCHW", "OIHW", "NCHW"),
        precision=jax.lax.Precision.HIGHEST)
    y = y + bias.reshape(1, -1, 1, 1)
    if gamma is not None:
        yt = jnp.transpose(y, (0, 2, 3, 1))
        mu = jnp.mean(yt, axis=-1, keepdims=True)
        d = yt - mu
        var = jnp.mean(d * d, axis=-1, keepdims=True)
        yt = d * jax.lax.rsqrt(var + eps)
        yt = yt * gamma.reshape(1, 1, 1, -1) + beta.reshape(1, 1, 1, -1)
        y = jnp.transpose(yt, (0, 3, 1, 2))
    return y  # NCHW, like PyTorch


# ----------------------------- Self-test --------------------------------
if __name__ == "__main__":
    key = jax.random.PRNGKey(0)
    k_x1, k_x2, k_x3, k_p, k_g, k_b = jax.random.split(key, 6)

    # --- 1) NCHW, no norm, single tile (B=2, C=3, 16x16 -> M=32) ---
    x1 = jax.random.normal(k_x1, (2, 3, 16, 16), jnp.float32)
    mod = PatchEmbed(patch_size=4, in_channels=3, embed_dim=96, use_norm=False, key=k_p)
    out_cl = jax.block_until_ready(jax.jit(lambda v: mod(v))(x1))
    out_nchw = jax.block_until_ready(jax.jit(lambda v: mod(v, channels_last=False))(x1))
    ref1 = jax.block_until_ready(
        _reference_patch_embed(x1, mod.conv_weight, mod.conv_bias, mod.patch_size))
    assert out_cl.shape == (2, 4, 4, 96), out_cl.shape
    assert out_cl.dtype == jnp.bfloat16, out_cl.dtype
    assert out_nchw.shape == (2, 96, 4, 4), out_nchw.shape
    assert jnp.allclose(out_nchw.astype(jnp.float32), ref1,
                        atol=2e-2, rtol=2e-2), "NCHW mismatch vs reference"
    assert jnp.allclose(out_cl.astype(jnp.float32), jnp.transpose(ref1, (0, 2, 3, 1)),
                        atol=2e-2, rtol=2e-2), "channels-last mismatch vs reference"

    # --- 2) NCHW + fused LayerNorm, multi-tile grid with ragged last tile ---
    # B=2, 36x36 -> Hp=Wp=9, M=162; tm=64 -> grid of 3 steps, last tile has 34 valid rows.
    assert pl.cdiv(2 * 9 * 9, _choose_tm(2 * 9 * 9, 64)) == 3
    x2 = jax.random.normal(k_x2, (2, 3, 36, 36), jnp.float32)
    g = 1.0 + 0.1 * jax.random.normal(k_g, (96,), jnp.float32)
    b = 0.1 * jax.random.normal(k_b, (96,), jnp.float32)
    mod_n = PatchEmbed(patch_size=4, in_channels=3, embed_dim=96, use_norm=True,
                       key=k_p, tm=64, ln_gamma=g, ln_beta=b)
    out_n = jax.block_until_ready(jax.jit(lambda v: mod_n(v))(x2))
    ref2 = jax.block_until_ready(_reference_patch_embed(
        x2, mod_n.conv_weight, mod_n.conv_bias, mod_n.patch_size, gamma=g, beta=b))
    assert out_n.shape == (2, 9, 9, 96), out_n.shape
    assert jnp.allclose(out_n.astype(jnp.float32), jnp.transpose(ref2, (0, 2, 3, 1)),
                        atol=3e-2, rtol=3e-2), "norm / multi-tile mismatch vs reference"

    # --- 3) NHWC input + H/W padding path (18x18 -> padded to 20, Hp=Wp=5, M=50) ---
    x3_nchw = jax.random.normal(k_x3, (2, 3, 18, 18), jnp.float32)
    x3_nhwc = jnp.transpose(x3_nchw, (0, 2, 3, 1))
    out3 = jax.block_until_ready(jax.jit(lambda v: mod(v, input_format="NHWC"))(x3_nhwc))
    ref3 = jax.block_until_ready(
        _reference_patch_embed(x3_nchw, mod.conv_weight, mod.conv_bias, mod.patch_size))
    assert out3.shape == (2, 5, 5, 96), out3.shape
    assert jnp.allclose(out3.astype(jnp.float32), jnp.transpose(ref3, (0, 2, 3, 1)),
                        atol=2e-2, rtol=2e-2), "NHWC / padding mismatch vs reference"

    print("KERNEL_OK")
</pallas_src>

<mosaic_0001>
module attributes {stable_mosaic.version = 11 : i64} {
  func.func @_proj_kernel(%arg0: i32, %arg1: memref<32x48xbf16, #tpu.memory_space<vmem>>, %arg2: memref<48x96xbf16, #tpu.memory_space<vmem>>, %arg3: memref<1x96xf32, #tpu.memory_space<vmem>>, %arg4: memref<32x96xbf16, #tpu.memory_space<vmem>>) attributes {dimension_semantics = [#tpu.dimension_semantics<parallel>], iteration_bounds = array<i64: 1>, scalar_prefetch = 0 : i64, scratch_operands = 0 : i64, tpu.core_type = #tpu.core_type<tc>, window_params = [{transform_indices = @transform_0, window_bounds = array<i64: 32, 48>}, {pipeline_mode = #tpu.pipeline_mode<synchronous>, transform_indices = @transform_1, window_bounds = array<i64: 48, 96>}, {pipeline_mode = #tpu.pipeline_mode<synchronous>, transform_indices = @transform_2, window_bounds = array<i64: 1, 96>}, {transform_indices = @transform_3, window_bounds = array<i64: 32, 96>}]} {
    %c0 = arith.constant 0 : index
    %c0_0 = arith.constant 0 : index
    %0 = vector.load %arg1[%c0, %c0_0] : memref<32x48xbf16, #tpu.memory_space<vmem>>, vector<32x48xbf16>
    %c0_1 = arith.constant 0 : index
    %c0_2 = arith.constant 0 : index
    %1 = vector.load %arg2[%c0_1, %c0_2] : memref<48x96xbf16, #tpu.memory_space<vmem>>, vector<48x96xbf16>
    %cst = arith.constant dense<0.000000e+00> : vector<32x96xf32>
    %2 = tpu.matmul %0, %1, %cst {dimension_numbers = #tpu.dot_dimension_numbers<[1], [0], [0], [1], [0, 0, 1, 1], [], []>} : vector<32x48xbf16>, vector<48x96xbf16>, vector<32x96xf32> -> vector<32x96xf32>
    %c0_3 = arith.constant 0 : index
    %c0_4 = arith.constant 0 : index
    %3 = vector.load %arg3[%c0_3, %c0_4] : memref<1x96xf32, #tpu.memory_space<vmem>>, vector<1x96xf32>
    %4 = vector.broadcast %3 : vector<1x96xf32> to vector<32x96xf32>
    %5 = arith.addf %2, %4 : vector<32x96xf32>
    %6 = arith.truncf %5 : vector<32x96xf32> to vector<32x96xbf16>
    %c0_5 = arith.constant 0 : index
    %c0_6 = arith.constant 0 : index
    %7 = vector.load %arg4[%c0_5, %c0_6] : memref<32x96xbf16, #tpu.memory_space<vmem>>, vector<32x96xbf16>
    tpu.vector_store %arg4[%c0_5, %c0_6], %6 {strides = array<i32>} : memref<32x96xbf16, #tpu.memory_space<vmem>>, vector<32x96xbf16>,
    return
  }
  func.func @transform_0(%arg0: i32) -> (i32, i32) {
    %c0_i32 = arith.constant 0 : i32
    %c0_i32_0 = arith.constant 0 : i32
    return %arg0, %c0_i32 : i32, i32
  }
  func.func @transform_1(%arg0: i32) -> (i32, i32) {
    %c0_i32 = arith.constant 0 : i32
    %c0_i32_0 = arith.constant 0 : i32
    %c0_i32_1 = arith.constant 0 : i32
    return %c0_i32, %c0_i32_0 : i32, i32
  }
  func.func @transform_2(%arg0: i32) -> (i32, i32) {
    %c0_i32 = arith.constant 0 : i32
    %c0_i32_0 = arith.constant 0 : i32
    %c0_i32_1 = arith.constant 0 : i32
    return %c0_i32, %c0_i32_0 : i32, i32
  }
  func.func @transform_3(%arg0: i32) -> (i32, i32) {
    %c0_i32 = arith.constant 0 : i32
    %c0_i32_0 = arith.constant 0 : i32
    return %arg0, %c0_i32 : i32, i32
  }
}

</mosaic_0001>

<bundles_post_ra>
// kernel: _lambda_.1
= control target key start
LH: loop header
LB: loop body
LE: loop exit
PB: predicated region body
PF: predicated region fallthrough
CT: control target
= control target key end

     0   :  { %vm61_vm0 = vcmask 392192   ;;  %s263_s0 = inlined_call_operand.vmem [shape: bf16[32,48], index: 0, kind: input, shape index: {}]   ;;  %s264_s1 = inlined_call_operand.vmem [shape: bf16[48,96], index: 1, kind: input, shape index: {}]   ;;  %s265_s2 = inlined_call_operand.vmem [shape: f32[1,96], index: 2, kind: input, shape index: {}]   ;;  %s266_s3 = inlined_call_operand.hbm [shape: bf16[32,96], index: 3, kind: output, shape index: {}]  }
   0x1   :  { %v188_v0 = vld [vmem:[%s264_s1 + $0x10] sm:$0xff]   ;;  %v189_v1 = vld [vmem:[%s264_s1 + $0x8] sm:$0xff]   ;;  %v191_v2 = vld [vmem:[%s263_s0] sm:$0xff]  }
   0x2   :  { %175 = vmatprep.subr.bf16.mxu0 %v188_v0  ;;  %v190_v3 = vld [vmem:[%s264_s1] sm:$0xff]   ;;  %181 = vmatprep.mubr.msk.bf16.mxu0 %vm61_vm0, %v191_v2 }
   0x3   :  { %176 = vmatpush3.bf16.msra.mxu0 %v188_v0 }
   0x4   :  { %177 = vmatprep.subr.bf16.mxu0 %v189_v1 }
   0x5   :  { %8 = vsyncpa [#allocation3], 0  ;;  %v192_v4 = vld [vmem:[%s263_s0 + $0x8] sm:$0xff]   ;;  %v154_v5 = vld [vmem:[%s265_s2] ss:$0 sm:$0xff]  ;;  %vm133_vm1 = vcmask 781312  }
   0x6   :  { %s215_s1 = smov [#allocation2]  }
   0x7   :  { %178 = vmatpush3.bf16.msra.mxu0 %v189_v1  ;;  %s143_s24 = sshll.u32 %s215_s1, 4  ;;  %s144_s24 = int_to_ptr.vmem [resolvable:$true] %s143_s24 }
   0x8   :  { %179 = vmatprep.subr.bf16.mxu0 %v190_v3  ;;  %s193_s0 = scalar_lea.vmem %s144_s24, 256  ;;  %p198_p1 = scmp.lt.s32.totalorder %s144_s24, %s144_s24 }
   0x9   :  { %p194_p0 = scmp.ne.s32.totalorder %s144_s24, %s193_s0  ;;  %p199_p2 = scmp.lt.s32.totalorder %s193_s0, %s193_s0 }
   0xb   :  { %180 = vmatpush3.bf16.msra.mxu0 %v190_v3  ;;  %p200_p3 = por %p199_p2, %p198_p1 }
   0xd   :  { %p201_p4 = pnand %p200_p3, %p194_p0 }
   0xe   :  { %182 = vmatmul.mubr.msk.bf16.vlgmr.msra.gmra.mxu0 %vm61_vm0, %v192_v4 }
  0xce   :  { %v183_v6 = vpop.f32.mrf.mxu0 }
  0xcf   :  { %v111_v7 = vadd.f32 %v183_v6, %v154_v5 }
  0xd0   :  { %v102_v8 = vpop.f32.mrf.mxu0 }
  0xd1   :  { %v168_v9 = vpack.c.bf16 %v111_v7, %v111_v7  ;;  %v103_v10 = vadd.f32 %v154_v5, %v102_v8 }
  0xd2   :  { %v184_v11 = vpop.f32.mrf.mxu0 }
  0xd3   :  { %136 = vst.msk [vmem:[#allocation2 + $0x8] sm:$0xf] %vm133_vm1, %v168_v9  ;;  %v166_v12 = vpack.c.bf16 %v103_v10, %v103_v10  ;;  %v114_v13 = vadd.f32 %v184_v11, %v154_v5 }
  0xd4   :  { %v105_v14 = vpop.f32.mrf.mxu0 }
  0xd5   :  { %134 = vst.msk [vmem:[#allocation2] sm:$0xf] %vm133_vm1, %v166_v12  ;;  %v169_v15 = vpack.c.bf16 %v114_v13, %v114_v13  ;;  %v106_v16 = vadd.f32 %v154_v5, %v105_v14 }
  0xd7   :  { %137 = vst.msk [vmem:[#allocation2 + $0xc] sm:$0xf] %vm133_vm1, %v169_v15  ;;  %v167_v17 = vpack.c.bf16 %v106_v16, %v106_v16 }
  0xd9   :  { %135 = vst.msk [vmem:[#allocation2 + $0x4] sm:$0xf] %vm133_vm1, %v167_v17 }
  0xda   :  { %204 = shalt.err (!%p201_p4)
}
  0xdb   :  { %s216_s2 = smov 64   ;;  %s217_s25 = smov 4  }
  0xdc   :  { %149 = dma.vmem_to_hbm [thread:$0]  %s144_s24, 256, %s266_s3, [#allocation3], %s216_s2, %s216_s2, %s217_s25  }
  0xdd   :  { %213 = dma.done.wait [#allocation3], 256  }
  0xde   :  { %214 = vsyncadd [#allocation3], 4294967040 }
  0xdf   :  { %153 = vsyncpa [#allocation3], 1 }

</bundles_post_ra>
